<compile_context>
chip_gen: v5e
topology: v5e:2x2
jax: 0.10.0
libtpu: 0.0.40
codegen_flags: <defaults>
</compile_context>

<pallas_src>
import functools

import jax
import jax.numpy as jnp
from jax.experimental import pallas as pl
from jax.experimental.pallas import tpu as pltpu


def _layernorm_kernel(x_ref, g_ref, b_ref, o_ref, *, eps):
    # x_ref: (C, TILE_S)   channels on sublanes, spatial positions on lanes.
    # g_ref / b_ref: (C, 1) resident parameter vectors (index_map is constant).
    x = x_ref[...].astype(jnp.float32)

    # Single sweep over the tile: E[x] and E[x^2] along the channel (sublane) axis.
    mean = jnp.mean(x, axis=0, keepdims=True)            # (1, TILE_S)
    mean_sq = jnp.mean(x * x, axis=0, keepdims=True)     # (1, TILE_S)
    var = jnp.maximum(mean_sq - mean * mean, 0.0)        # unbiased=False; clamp fp noise
    std = jnp.sqrt(var)

    # eps is added to std (PyTorch reference), so sqrt-then-reciprocal is deliberate.
    inv = pl.reciprocal(std + eps, approx=True)          # EUP slot, effectively free

    g = g_ref[...].astype(jnp.float32)                   # (C, 1) -> broadcasts over lanes
    b = b_ref[...].astype(jnp.float32)
    y = (x - mean) * inv * g + b
    o_ref[...] = y.astype(o_ref.dtype)


def _vmem_budget():
    """Return (target bytes per x block, vmem_limit_bytes), tuned per generation."""
    try:
        vmem = pltpu.get_tpu_info().vmem_capacity_bytes
    except Exception:
        vmem = 64 << 20  # conservative default: assume v7x-sized VMEM
    if vmem >= (128 << 20):          # v5e / v6e: 128 MiB VMEM
        return 8 << 20, 96 << 20
    return 4 << 20, 48 << 20         # v7x: 64 MiB VMEM -> keep double-buffer headroom


def _choose_tile_s(S, target_elems):
    """Lane-axis tile: multiple of 128; prefer an exact divisor of S (no edge masking)."""
    target = max(128, (target_elems // 128) * 128)
    s_up = ((S + 127) // 128) * 128
    if s_up <= target:
        return s_up                  # whole spatial extent in one (edge-masked) block
    if S % 128 == 0:
        for t in range(target, 127, -128):
            if S % t == 0:
                return t             # largest multiple-of-128 divisor <= target
    return target                    # ragged edge handled by Pallas masked partial block


def layernorm_channel(x, g, b, eps=1e-5):
    """x: (B, C, T, H, W) NCDHW.  g, b: (1, C, 1, 1, 1).  Returns same shape as x."""
    B, C, T, H, W = x.shape
    S = T * H * W

    # Native-layout views only — no HBM transposes, no HBM padding pass.
    x3 = x.reshape(B, C, S)
    g2 = g.reshape(C, 1)
    b2 = b.reshape(C, 1)

    itemsize = jnp.dtype(x.dtype).itemsize
    block_bytes, vmem_limit = _vmem_budget()
    tile_s = _choose_tile_s(S, block_bytes // (C * itemsize))

    grid = (B, pl.cdiv(S, tile_s))
    kernel = functools.partial(_layernorm_kernel, eps=eps)

    out3 = pl.pallas_call(
        kernel,
        out_shape=jax.ShapeDtypeStruct((B, C, S), x.dtype),
        grid_spec=pltpu.PrefetchScalarGridSpec(
            num_scalar_prefetch=0,
            grid=grid,
            in_specs=[
                # x block: (C, TILE_S) after squeezing the batch dim.
                pl.BlockSpec((pl.Squeezed(), C, tile_s), lambda bi, si: (bi, 0, si)),
                pl.BlockSpec((C, 1), lambda bi, si: (0, 0)),   # gamma (resident)
                pl.BlockSpec((C, 1), lambda bi, si: (0, 0)),   # beta  (resident)
            ],
            out_specs=pl.BlockSpec(
                (pl.Squeezed(), C, tile_s), lambda bi, si: (bi, 0, si)),
        ),
        compiler_params=pltpu.CompilerParams(
            dimension_semantics=("parallel", "parallel"),
            vmem_limit_bytes=vmem_limit,
        ),
    )(x3, g2, b2)

    return out3.reshape(B, C, T, H, W)


if __name__ == "__main__":
    key = jax.random.PRNGKey(0)
    B, C, T, H, W = 2, 4, 4, 8, 8
    kx, kg, kb = jax.random.split(key, 3)
    x = jax.random.normal(kx, (B, C, T, H, W), dtype=jnp.float32)

    # pure-JAX reference of the PyTorch math
    mean = jnp.mean(x, axis=1, keepdims=True)
    var = jnp.mean((x - mean) ** 2, axis=1, keepdims=True)

    # 1) module-default parameters (ones / zeros)
    g = jnp.ones((1, C, 1, 1, 1), dtype=jnp.float32)
    b = jnp.zeros((1, C, 1, 1, 1), dtype=jnp.float32)
    out = jax.block_until_ready(layernorm_channel(x, g, b, eps=1e-5))
    ref = (x - mean) / (jnp.sqrt(var) + 1e-5) * g + b
    assert jnp.allclose(out, ref, atol=5e-3, rtol=5e-3), float(jnp.max(jnp.abs(out - ref)))

    # 2) non-trivial gamma/beta to exercise the scale/shift path
    g2 = 1.0 + 0.1 * jax.random.normal(kg, (1, C, 1, 1, 1), dtype=jnp.float32)
    b2 = 0.1 * jax.random.normal(kb, (1, C, 1, 1, 1), dtype=jnp.float32)
    out2 = jax.block_until_ready(layernorm_channel(x, g2, b2, eps=1e-5))
    ref2 = (x - mean) / (jnp.sqrt(var) + 1e-5) * g2 + b2
    assert jnp.allclose(out2, ref2, atol=5e-3, rtol=5e-3), float(jnp.max(jnp.abs(out2 - ref2)))

    print("KERNEL_OK")
</pallas_src>

<mosaic_0001>
module attributes {stable_mosaic.version = 11 : i64} {
  func.func @_layernorm_kernel(%arg0: i32, %arg1: i32, %arg2: memref<1x4x256xf32, #tpu.memory_space<vmem>>, %arg3: memref<4x1xf32, #tpu.memory_space<vmem>>, %arg4: memref<4x1xf32, #tpu.memory_space<vmem>>, %arg5: memref<1x4x256xf32, #tpu.memory_space<vmem>>) attributes {dimension_semantics = [#tpu.dimension_semantics<parallel>, #tpu.dimension_semantics<parallel>], iteration_bounds = array<i64: 2, 1>, scalar_prefetch = 0 : i64, scratch_operands = 0 : i64, tpu.core_type = #tpu.core_type<tc>, window_params = [{transform_indices = @transform_0, window_bounds = array<i64: 1, 4, 256>}, {pipeline_mode = #tpu.pipeline_mode<synchronous>, transform_indices = @transform_1, window_bounds = array<i64: 4, 1>}, {pipeline_mode = #tpu.pipeline_mode<synchronous>, transform_indices = @transform_2, window_bounds = array<i64: 4, 1>}, {transform_indices = @transform_3, window_bounds = array<i64: 1, 4, 256>}]} {
    %c0 = arith.constant 0 : index
    %c0_0 = arith.constant 0 : index
    %c0_1 = arith.constant 0 : index
    %0 = vector.load %arg2[%c0, %c0_0, %c0_1] : memref<1x4x256xf32, #tpu.memory_space<vmem>>, vector<1x4x256xf32>
    %1 = vector.shape_cast %0 : vector<1x4x256xf32> to vector<4x256xf32>
    %cst = arith.constant dense<0.000000e+00> : vector<256xf32>
    %2 = vector.multi_reduction <add>, %1, %cst [0] : vector<4x256xf32> to vector<256xf32>
    %3 = vector.shape_cast %2 : vector<256xf32> to vector<1x256xf32>
    %cst_2 = arith.constant 4.000000e+00 : f32
    %4 = vector.broadcast %cst_2 : f32 to vector<1x256xf32>
    %5 = arith.divf %3, %4 : vector<1x256xf32>
    %6 = arith.mulf %1, %1 : vector<4x256xf32>
    %cst_3 = arith.constant dense<0.000000e+00> : vector<256xf32>
    %7 = vector.multi_reduction <add>, %6, %cst_3 [0] : vector<4x256xf32> to vector<256xf32>
    %8 = vector.shape_cast %7 : vector<256xf32> to vector<1x256xf32>
    %cst_4 = arith.constant 4.000000e+00 : f32
    %9 = vector.broadcast %cst_4 : f32 to vector<1x256xf32>
    %10 = arith.divf %8, %9 : vector<1x256xf32>
    %11 = arith.mulf %5, %5 : vector<1x256xf32>
    %12 = arith.subf %10, %11 : vector<1x256xf32>
    %cst_5 = arith.constant 0.000000e+00 : f32
    %13 = vector.broadcast %cst_5 : f32 to vector<1x256xf32>
    %14 = arith.maximumf %12, %13 : vector<1x256xf32>
    %15 = math.sqrt %14 : vector<1x256xf32>
    %cst_6 = arith.constant 9.99999974E-6 : f32
    %16 = vector.broadcast %cst_6 : f32 to vector<1x256xf32>
    %17 = arith.addf %15, %16 : vector<1x256xf32>
    %18 = tpu.reciprocal %17 {approx = true} : vector<1x256xf32> -> vector<1x256xf32>
    %c0_7 = arith.constant 0 : index
    %c0_8 = arith.constant 0 : index
    %19 = vector.load %arg3[%c0_7, %c0_8] : memref<4x1xf32, #tpu.memory_space<vmem>>, vector<4x1xf32>
    %c0_9 = arith.constant 0 : index
    %c0_10 = arith.constant 0 : index
    %20 = vector.load %arg4[%c0_9, %c0_10] : memref<4x1xf32, #tpu.memory_space<vmem>>, vector<4x1xf32>
    %21 = vector.broadcast %5 : vector<1x256xf32> to vector<4x256xf32>
    %22 = arith.subf %1, %21 : vector<4x256xf32>
    %23 = vector.broadcast %18 : vector<1x256xf32> to vector<4x256xf32>
    %24 = arith.mulf %22, %23 : vector<4x256xf32>
    %25 = vector.broadcast %19 : vector<4x1xf32> to vector<4x256xf32>
    %26 = arith.mulf %24, %25 : vector<4x256xf32>
    %27 = vector.broadcast %20 : vector<4x1xf32> to vector<4x256xf32>
    %28 = arith.addf %26, %27 : vector<4x256xf32>
    %c0_11 = arith.constant 0 : index
    %c0_12 = arith.constant 0 : index
    %c0_13 = arith.constant 0 : index
    %29 = vector.load %arg5[%c0_11, %c0_12, %c0_13] : memref<1x4x256xf32, #tpu.memory_space<vmem>>, vector<1x4x256xf32>
    %30 = vector.shape_cast %29 : vector<1x4x256xf32> to vector<4x256xf32>
    %31 = vector.shape_cast %28 : vector<4x256xf32> to vector<1x4x256xf32>
    tpu.vector_store %arg5[%c0_11, %c0_12, %c0_13], %31 {strides = array<i32>} : memref<1x4x256xf32, #tpu.memory_space<vmem>>, vector<1x4x256xf32>,
    return
  }
  func.func @transform_0(%arg0: i32, %arg1: i32) -> (i32, i32, i32) {
    %c0_i32 = arith.constant 0 : i32
    %c0_i32_0 = arith.constant 0 : i32
    return %arg0, %c0_i32, %arg1 : i32, i32, i32
  }
  func.func @transform_1(%arg0: i32, %arg1: i32) -> (i32, i32) {
    %c0_i32 = arith.constant 0 : i32
    %c0_i32_0 = arith.constant 0 : i32
    %c0_i32_1 = arith.constant 0 : i32
    return %c0_i32, %c0_i32_0 : i32, i32
  }
  func.func @transform_2(%arg0: i32, %arg1: i32) -> (i32, i32) {
    %c0_i32 = arith.constant 0 : i32
    %c0_i32_0 = arith.constant 0 : i32
    %c0_i32_1 = arith.constant 0 : i32
    return %c0_i32, %c0_i32_0 : i32, i32
  }
  func.func @transform_3(%arg0: i32, %arg1: i32) -> (i32, i32, i32) {
    %c0_i32 = arith.constant 0 : i32
    %c0_i32_0 = arith.constant 0 : i32
    return %arg0, %c0_i32, %arg1 : i32, i32, i32
  }
}

</mosaic_0001>

<bundles_post_ra>
// kernel: tpu_custom_call.1
= control target key start
LH: loop header
LB: loop body
LE: loop exit
PB: predicated region body
PF: predicated region fallthrough
CT: control target
= control target key end

     0   :  { %8 = vsyncpa [#allocation3], 0  ;;  %s807_s0 = inlined_call_operand.hbm [shape: f32[2,4,256], index: 0, kind: input, shape index: {}]   ;;  %s808_s1 = inlined_call_operand.vmem [shape: f32[4,1], index: 1, kind: input, shape index: {}]   ;;  %s809_s2 = inlined_call_operand.vmem [shape: f32[4,1], index: 2, kind: input, shape index: {}]   ;;  %s810_s3 = inlined_call_operand.hbm [shape: f32[2,4,256], index: 3, kind: output, shape index: {}]  }
   0x1   :  { %10 = vsyncpa [#allocation3 + $0x1], 0 }
   0x2   :  { %11 = vsyncpa [#allocation4], 0 }
   0x3   :  { %13 = vsyncpa [#allocation4 + $0x1], 0  ;;  %s665_s12 = smov 0   ;;  %s667_s13 = smov 0  }
   0x4   :  { %s669_s14 = smov 0   ;;  %s671_s15 = smov 0  }
   0x5   :  { %s673_s16 = smov 0   ;;  %s675_s17 = smov 0  }
   0x6 LB: > { %s435_s18 = sadd.s32 4294967295, %s640_s17   ;;  %s436_s19 = sadd.s32 4294967294, %s640_s17   ;;  %s640_s17 = sphi %s675_s17, %s19_s17   ;;  %s636_s16 = sphi %s673_s16, %s819_s16   ;;  %s632_s15 = sphi %s671_s15, %s818_s15   ;;  %s628_s14 = sphi %s669_s14, %s817_s14   ;;  %s624_s13 = sphi %s667_s13, %s816_s13   ;;  %s620_s12 = sphi %s665_s12, %s815_s12  }
   0x7   : > { %s31_s20 = sadd.s32 1, %s636_s16  ;;  %s40_s21 = sadd.s32 1, %s628_s14 }
   0x8   : > { %p33_p0 = scmp.ge.s32.totalorder %s31_s20, 2  ;;  %p47_p1 = scmp.ne.s32.totalorder %s628_s14, %s624_s13 }
   0x9   : > { %p48_p2 = scmp.eq.s32.totalorder %s640_s17, 0  ;;  %p53_p3 = scmp.ne.s32.totalorder %s624_s13, %s620_s12 }
   0xa   : > { %s821_s20 = smov (%p33_p0, %s31_s20), 0  ;;  %p54_p5 = scmp.eq.s32.totalorder %s435_s18, 0 }
   0xb   : > { %p706_p4 = por %p48_p2, %p47_p1  ;;  %s35_s23 = ssub.s32 %s636_s16, %s821_s20 }
   0xc   : > { %p121_p6 = scmp.eq.s32.totalorder %s435_s18, 1  ;;  %p38_p7 = scmp.eq.s32.totalorder %s35_s23, 0 }
   0xd   : > { %p712_p8 = por %p54_p5, %p53_p3  ;;  %p127_p10 = scmp.eq.s32.totalorder %s436_s19, 1 }
   0xe   : > { %p716_p9 = por %p121_p6, %p47_p1  ;;  %p438_p12 = scmp.ge.s32.totalorder %s640_s17, 2 }
   0xf   : > { %s721_s26 = scalar_select %p38_p7, %s628_s14, %s40_s21  }
  0x10   : > { %p723_p11 = por %p127_p10, %p53_p3  ;;  %p464_p13 = scmp.lt.s32.totalorder %s640_s17, 2 }
  0x11   : > { %s153_s28 = sand.u32 1, %s628_s14   ;;  %s450_s30 = sshll.u32 %s636_s16, 3 }
  0x12   : > { %s439_s29 = sshll.u32 %s153_s28, 3  ;;  %s164_s6 = scalar_lea.hbm %s807_s0, %s450_s30 }
  0x13   : > { %s157_s7 = scalar_lea.vmem [#allocation2], %s439_s29  ;;  %s166_s9 = sshll.u32 %s164_s6, 4  ;;  %s167_s9 = int_to_ptr.hbm [resolvable:$true] %s166_s9 }
  0x14   : > { %s168_s8 = sshll.u32 %s157_s7, 4  ;;  %p457_p0 = pnand %p464_p13, %p706_p4  ;;  %s169_s8 = int_to_ptr.vmem [resolvable:$true] %s168_s8 }
  0x15   : > { %p442_p1 = scmp.ge.s32.totalorder %s640_s17, 1  ;;  %p173_p2 = scmp.lt.s32.totalorder %s640_s17, 3 }
  0x16   : > { %s154_s10 = scalar_lea.sflag [#allocation3], %s153_s28 }
  0x17   : > { %459 = dma.hbm_to_vmem [thread:$0]  (!%p457_p0), %s167_s9, 128, %s169_s8, %s154_s10  }
  0x18   : > { %p174_p3 = pnand %p442_p1, %p173_p2 }
  0x19   : > { %s739_s11 = sand.u32 (!%p174_p3), 1, %s624_s13  }
  0x1a   : > { %177 = sbr.rel (%p174_p3) target bundleno = 164 (0xa4), region = 32  ;;  %s443_s18 = sshll.u32 (!%p174_p3), %s739_s11, 3 }
  0x1b   : > { %s180_s19 = scalar_lea.sflag (!%p174_p3), [#allocation3], %s739_s11  ;;  %s183_s21 = scalar_lea.vmem (!%p174_p3), [#allocation2], %s443_s18 }
  0x1f   : > { %611 = dma.done.wait (%p712_p8), %s180_s19, 128  }
  0x20   : > { %613 = vsyncadd (%p712_p8), %s180_s19, 4294967168  ;;  %v642_v0 = vmov 0   ;;  %v297_v1 = vld [vmem:[%s808_s1] sm:$0xf]  ;;  %v755_v3 = vld [vmem:[%s183_s21] sm:$0xff]  ;;  %v643_v4 = vmov 4.0  }
  0x21   : > { %517 = vset.pattern.permute.xlu0 %v642_v0  ;;  %v298_v2 = vld [vmem:[%s809_s2] sm:$0xf]  ;;  %211 = vst [vmem:[#allocation1] ss:$2 sm:$0xff] %v755_v3  ;;  %518 = vrcp.f32 %v643_v4  ;;  %v240_v5 = vmul.f32 %v755_v3, %v755_v3  ;;  %vm216_vm0 = vcmask 1043456   ;;  %s451_s24 = sshll.u32 %s632_s15, 3 }
  0x22   : > { %313 = vperm.xlu0 %517, %v297_v1   ;;  %s346_s5 = scalar_lea.hbm %s810_s3, %s451_s24  ;;  %s206_s6 = scalar_lea.vmem [#allocation5], %s443_s18 }
  0x23   : > { %s348_s7 = sshll.u32 %s206_s6, 4  ;;  %s350_s8 = sshll.u32 %s346_s5, 4  ;;  %s349_s7 = int_to_ptr.vmem [resolvable:$true] %s348_s7  ;;  %s351_s8 = int_to_ptr.hbm [resolvable:$true] %s350_s8 }
  0x24   : > { %s333_s9 = scalar_lea.sflag [#allocation4], %s739_s11  ;;  %s572_s15 = sshra.s32 %s351_s8, 4  ;;  %s573_s15 = int_to_ptr.hbm [resolvable:$true] %s572_s15 }
  0x25   : > { %s574_s10 = scalar_lea.hbm %s573_s15, 8  ;;  %s578_s18 = scalar_lea.hbm %s810_s3, 16 }
  0x26   : > { %p575_p4 = scmp.ne.s32.totalorder %s573_s15, %s574_s10  ;;  %p579_p7 = scmp.lt.s32.totalorder %s573_s15, %s810_s3 }
  0x27   : > { %v519_v6 = vpop.eup %518  ;;  %p580_p8 = scmp.lt.s32.totalorder %s578_s18, %s574_s10 }
  0x28   : > { %v212_v7 = vld.sshfl [vmem:[#allocation1] sm:$0xff pattern:$0x75316420]  ;;  %v213_v8 = vld.sshfl [vmem:[#allocation1 + $0x8] sm:$0xff pattern:$0x75316420]  ;;  %vm236_vm1 = vweird.f32 %v519_v6  ;;  %p576_p5 = pnand %p575_p4, %p716_p9 }
  0x29   : > { %242 = vst [vmem:[#allocation1] ss:$2 sm:$0xff] %v240_v5  ;;  %v232_v9 = vmul.f32 4.0, %v519_v6  ;;  %v224_v11 = vsel %vm216_vm0, %v213_v8, 0.0  ;;  %v217_v14 = vsel %vm216_vm0, %v212_v7, 0.0  ;;  %p581_p10 = por %p580_p8, %p579_p7 }
  0x2a   : > { %323 = vperm.xlu0 %517, %v298_v2   ;;  %v225_v12 = vrot.slane %v224_v11, 4  ;;  %v218_v16 = vrot.slane %v217_v14, 4  ;;  %p577_p6 = pneg %p576_p5 }
  0x2b   : > { %v233_v10 = vsub.f32 1.0, %v232_v9 }
  0x2c   : > { %v226_v17 = vadd.f32 %v225_v12, %v224_v11  ;;  %v219_v22 = vadd.f32 %v218_v16, %v217_v14  ;;  %p582_p13 = pnand %p581_p10, %p577_p6 }
  0x2d   : > { %v234_v20 = vmul.f32 %v519_v6, %v233_v10 }
  0x2e   : > { %v227_v23 = vrot.slane %v226_v17, 2  ;;  %v220_v26 = vrot.slane %v219_v22, 2 }
  0x2f   : > { %v235_v30 = vadd.f32 %v519_v6, %v234_v20 }
  0x30   : > { %v244_v13 = vld.sshfl [vmem:[#allocation1 + $0x8] sm:$0xff pattern:$0x75316420]  ;;  %v243_v18 = vld.sshfl [vmem:[#allocation1] sm:$0xff pattern:$0x75316420]  ;;  %v228_v27 = vadd.f32 %v227_v23, %v226_v17  ;;  %v221_v31 = vadd.f32 %v220_v26, %v219_v22 }
  0x31   : > { %v254_v15 = vsel %vm216_vm0, %v244_v13, 0.0  ;;  %v247_v21 = vsel %vm216_vm0, %v243_v18, 0.0  ;;  %v237_v39 = vsel %vm236_vm1, %v519_v6, %v235_v30 }
  0x32   : > { %v255_v19 = vrot.slane %v254_v15, 4  ;;  %v248_v24 = vrot.slane %v247_v21, 4  ;;  %v229_v32 = vrot.slane %v228_v27, 1  ;;  %v222_v35 = vrot.slane %v221_v31, 1 }
  0x34   : > { %v256_v25 = vadd.f32 %v255_v19, %v254_v15  ;;  %v249_v28 = vadd.f32 %v248_v24, %v247_v21  ;;  %v230_v36 = vadd.f32 %v229_v32, %v228_v27  ;;  %v223_v40 = vadd.f32 %v222_v35, %v221_v31 }
  0x35   : > { %v644_v15 = vmov 839922192  }
  0x36   : > { %v257_v29 = vrot.slane %v256_v25, 2  ;;  %v250_v33 = vrot.slane %v249_v28, 2  ;;  %v239_v41 = vmul.f32 %v237_v39, %v230_v36  ;;  %v238_v44 = vmul.f32 %v237_v39, %v223_v40 }
  0x37   : > { %v316_v16 = vunpack.c.l.s4 %v644_v15 }
  0x38   : > { %v258_v34 = vadd.f32 %v257_v29, %v256_v25  ;;  %v251_v37 = vadd.f32 %v250_v33, %v249_v28  ;;  %v264_v47 = vmul.f32 %v239_v41, %v239_v41  ;;  %v263_v49 = vmul.f32 %v238_v44, %v238_v44 }
  0x39   : > { %v301_v13 = vrot.slane %v239_v41, 4  ;;  %v317_v21 = vunpack.c.0.s8 %v316_v16 }
  0x3a   : > { %v259_v38 = vrot.slane %v258_v34, 1  ;;  %v252_v42 = vrot.slane %v251_v37, 1 }
  0x3b   : > { %v302_v17 = vsel %vm216_vm0, %v238_v44, %v301_v13 }
  0x3c   : > { %v260_v43 = vadd.f32 %v259_v38, %v258_v34  ;;  %v253_v45 = vadd.f32 %v252_v42, %v251_v37  ;;  %v304_v22 = vsub.f32 %v755_v3, %v302_v17 }
  0x3e   : > { %v262_v46 = vmul.f32 %v260_v43, %v237_v39  ;;  %v261_v48 = vmul.f32 %v253_v45, %v237_v39 }
  0x40   : > { %v266_v50 = vsub.f32 %v262_v46, %v264_v47  ;;  %v265_v51 = vsub.f32 %v261_v48, %v263_v49 }
  0x42   : > { %v268_v52 = vmax.f32 %v266_v50, 0.0  ;;  %v267_v53 = vmax.f32 %v265_v51, 0.0 }
  0x44   : > { %520 = vrsqrt.f32 %v268_v52  ;;  %vm288_vm2 = vcmp.eq.f32.partialorder %v268_v52, inf  ;;  %v291_v4 = vand.u32 2147483648, %v268_v52  ;;  %vm290_vm3 = vcmp.eq.f32.partialorder %v268_v52, 0.0 }
  0x45   : > { %522 = vrsqrt.f32 %v267_v53  ;;  %vm276_vm4 = vcmp.eq.f32.partialorder %v267_v53, inf  ;;  %v279_v7 = vand.u32 2147483648, %v267_v53  ;;  %vm278_vm5 = vcmp.eq.f32.partialorder %v267_v53, 0.0 }
  0x4a   : > { %v521_v54 = vpop.eup %520 }
  0x4b   : > { %v282_v55 = vmul.f32 %v521_v54, %v268_v52  ;;  %v523_v56 = vpop.eup %522 }
  0x4c   : > { %v270_v57 = vmul.f32 %v523_v56, %v267_v53 }
  0x4d   : > { %v283_v58 = vmul.f32 %v521_v54, %v282_v55 }
  0x4e   : > { %v271_v59 = vmul.f32 %v523_v56, %v270_v57 }
  0x4f   : > { %v284_v60 = vmul.f32 0.5, %v283_v58 }
  0x50   : > { %v272_v61 = vmul.f32 0.5, %v271_v59 }
  0x51   : > { %v285_v62 = vsub.f32 1.5, %v284_v60 }
  0x52   : > { %v273_v63 = vsub.f32 1.5, %v272_v61 }
  0x53   : > { %v286_v0 = vmul.f32 %v521_v54, %v285_v62 }
  0x54   : > { %v274_v1 = vmul.f32 %v523_v56, %v273_v63 }
  0x55   : > { %v287_v2 = vmul.f32 %v286_v0, %v268_v52 }
  0x56   : > { %v275_v5 = vmul.f32 %v274_v1, %v267_v53 }
  0x57   : > { %v289_v6 = vsel %vm288_vm2, %v268_v52, %v287_v2 }
  0x58   : > { %v292_v8 = vsel %vm290_vm3, %v291_v4, %v289_v6  ;;  %v277_v9 = vsel %vm276_vm4, %v267_v53, %v275_v5 }
  0x59   : > { %v294_v10 = vadd.f32 1e-05, %v292_v8  ;;  %v280_v11 = vsel %vm278_vm5, %v279_v7, %v277_v9 }
  0x5a   : > { %v293_v12 = vadd.f32 1e-05, %v280_v11 }
  0x5b   : > { %524 = vrcp.f32 %v294_v10 }
  0x5c   : > { %526 = vrcp.f32 %v293_v12 }
  0x61   : > { %v525_v14 = vpop.eup %524 }
  0x62   : > { %v307_v18 = vrot.slane %v525_v14, 4  ;;  %v527_v19 = vpop.eup %526 }
  0x64   : > { %v308_v23 = vsel %vm216_vm0, %v527_v19, %v307_v18 }
  0x65   : > { %v310_v24 = vmul.f32 %v308_v23, %v304_v22 }
  0x94   : > { %v314_v20 = vpop.permute.xlu0 %313 }
  0x95   : > { %v318_v25 = vperm.slane %v314_v20, %v317_v21 }
  0x97   : > { %v320_v27 = vmul.f32 %v318_v25, %v310_v24 }
  0x9c   : > { %v324_v26 = vpop.permute.xlu0 %323 }
  0x9d   : > { %v328_v28 = vperm.slane %v324_v26, %v317_v21 }
  0x9f   : > { %v330_v29 = vadd.f32 %v328_v28, %v320_v27 }
  0xa1   : > { %331 = vst [vmem:[%s206_s6] sm:$0xff] %v330_v29 }
  0xa2   : > { %585 = shalt.err (!%p582_p13)
}
  0xa3   : > { %454 = dma.vmem_to_hbm [thread:$0]  (%p716_p9), %s349_s7, 128, %s351_s8, %s333_s9  }
  0xa4 PF: > { %s362_s11 = sand.u32 1, %s620_s12   ;;  %p461_p0 = pnand %p438_p12, %p723_p11 }
  0xa5   : > { %s363_s28 = scalar_lea.sflag [#allocation4], %s362_s11 }
  0xa6   : > { %p462_p1 = pneg %p461_p0 }
  0xa8   : > { %615 = dma.done.wait (%p462_p1), %s363_s28, 128  }
  0xa9   : > { %617 = vsyncadd (%p462_p1), %s363_s28, 4294967168  ;;  %s19_s17 = sadd.s32 1, %s640_s17   ;;  %s815_s12 = smov %s624_s13 }
  0xaa   : > { %p16_p2 = scmp.ge.s32.totalorder %s19_s17, 4   ;;  %s816_s13 = smov %s628_s14 }
  0xab   : > { %s817_s14 = smov %s721_s26  ;;  %s818_s15 = smov %s636_s16 }
  0xac   : > { %s819_s16 = smov %s821_s20  ;;  %18 = sbr.rel (!%p16_p2) target bundleno = 6 (0x6), region = 77 }
  0xb1   :  { %369 = vsyncpa [#allocation3], 1 }
  0xb2   :  { %371 = vsyncpa [#allocation3 + $0x1], 1 }
  0xb3   :  { %372 = vsyncpa [#allocation4], 1 }
  0xb4   :  { %374 = vsyncpa [#allocation4 + $0x1], 1 }

</bundles_post_ra>
